<compile_context>
chip_gen: v6e
topology: v6e:2x2x1
jax: 0.10.0
libtpu: 0.0.40
codegen_flags: <defaults>
</compile_context>

<pallas_src>
import functools
from collections import namedtuple

import jax
import jax.numpy as jnp
from jax import lax
from jax.experimental import pallas as pl
from jax.experimental.pallas import tpu as pltpu


def _round_up(v, m):
    return (v + m - 1) // m * m


_Plan = namedtuple("_Plan", "sub_n n_splits split_cols tile_n n_tiles n_pad")


def plan_tiles(N, D):
    """Static tiling plan for the training-point (N) axis."""
    sub_n = min(512, _round_up(N, 128))                 # inner vreg-friendly chunk
    bytes_per_col = (D + 3) * 4
    cols_budget = (12 * 2 ** 20) // (3 * bytes_per_col)  # keep streams <= ~12 MiB
    tile_cap = max(sub_n, min(8192, cols_budget // sub_n * sub_n))

    def geom(n_splits):
        cols = _round_up(-(-N // n_splits), sub_n)
        n_tiles = max(1, -(-cols // tile_cap))
        tile_n = _round_up(-(-cols // n_tiles), sub_n)
        return n_tiles * tile_n, tile_n, n_tiles

    n_splits = 2                                        # expose 2 parallel blocks (v7x)
    split_cols, tile_n, n_tiles = geom(2)
    if split_cols >= N:                                 # 2nd split would be all padding
        n_splits = 1
        split_cols, tile_n, n_tiles = geom(1)
    return _Plan(sub_n, n_splits, split_cols, tile_n, n_tiles, n_splits * split_cols)


def prepare_train_data(train_data):
    """Build the fused lane-dense training-side stream once.

    Rows: [ y^T (D) | ones | ||y||^2 | mask bias (0 real cols, -inf padding) ].
    train_data is usually static across calls; cache the result and pass it via
    `prepared=` to skip the per-call transpose / reductions / padding.
    """
    y = train_data.astype(jnp.float32)
    N, D = y.shape
    plan = plan_tiles(N, D)
    pad = plan.n_pad - N
    aug = jnp.concatenate([
        jnp.pad(y.T, ((0, 0), (0, pad))),
        jnp.pad(jnp.ones((1, N), jnp.float32), ((0, 0), (0, pad))),
        jnp.pad(jnp.sum(y * y, axis=1)[None, :], ((0, 0), (0, pad))),
        jnp.pad(jnp.zeros((1, N), jnp.float32), ((0, 0), (0, pad)),
                constant_values=-jnp.inf),
    ], axis=0)                                           # (D + 3, n_pad)
    # TODO(synk): optional bf16 streaming of `aug` on v5e (halves HBM traffic);
    # kept f32 here to protect the cancellation-prone expanded-norm logpdf.
    return plan, aug


# ----------------------------------------------------------------------------
# Kernel: grid = (n_splits, batch tiles, N tiles per split).  Emits per-split
# online-logsumexp statistics [m | sum p*y | sum p]; the empirical-Bayes
# renormalization and final score are a tiny O(B*D) epilogue in the wrapper.
# ----------------------------------------------------------------------------
def _gmm_eb_stats_kernel(xms_ref, aug_ref, stats_ref, m_acc, lw_acc,
                         *, feat_dim, sub_n, n_sub, use_mxu_logpdf):
    n_idx = pl.program_id(2)

    @pl.when(n_idx == 0)
    def _init():
        m_acc[...] = jnp.full_like(m_acc, -jnp.inf)
        lw_acc[...] = jnp.zeros_like(lw_acc)

    xm = xms_ref[...]                                    # (tB, D+2) = [x | mean | sigma]
    x = xm[:, 0:feat_dim]
    mean = xm[:, feat_dim:feat_dim + 1]
    sig = xm[:, feat_dim + 1:feat_dim + 2]

    inv_s2 = 1.0 / (sig * sig)
    xsq = jnp.sum(x * x, axis=1, keepdims=True)
    # logpdf = c0 + <c1*x, y_i> + c2*||y_i||^2  (per-row constants, VALU-lean)
    c0 = -0.5 * inv_s2 * xsq
    c1 = mean * inv_s2
    c2 = -0.5 * (mean * mean) * inv_s2
    xs = c1 * x                                          # (tB, D) prescaled rows
    if use_mxu_logpdf:
        coef = jnp.concatenate([xs, c0, c2], axis=1)     # vs rows [y ; ones ; ||y||^2]

    def body(i, carry):
        m_prev, lw_prev = carry
        col = pl.ds(pl.multiple_of(i * sub_n, sub_n), sub_n)
        yred = aug_ref[pl.ds(0, feat_dim + 1), col]      # [y^T ; ones]   (D+1, sub_n)
        msk = aug_ref[pl.ds(feat_dim + 2, 1), col]       # (1, sub_n)  0 / -inf
        if use_mxu_logpdf:                               # large D: one MXU pass
            yq = aug_ref[pl.ds(0, feat_dim + 2), col]    # [y^T ; ones ; ||y||^2]
            lp = lax.dot_general(coef, yq, (((1,), (0,)), ((), ())),
                                 preferred_element_type=jnp.float32) + msk
        else:                                            # tiny D: depth-D VPU contraction
            ysq = aug_ref[pl.ds(feat_dim + 1, 1), col]
            lp = c0 + c2 * ysq + msk
            for d in range(feat_dim):
                lp = lp + xs[:, d:d + 1] * yred[d:d + 1, :]

        # online logsumexp update: max on XLU, exp on EUP
        m_new = jnp.maximum(m_prev, jnp.max(lp, axis=1, keepdims=True))
        alpha = jnp.exp(m_prev - m_new)
        p = jnp.exp(lp - m_new)
        # both lane reductions ([sum p*y, sum p]) in one MXU pass (transposed-RHS feed)
        red = lax.dot_general(p, yred, (((1,), (1,)), ((), ())),
                              preferred_element_type=jnp.float32)  # (tB, D+1)
        return m_new, alpha * lw_prev + red

    m_fin, lw_fin = lax.fori_loop(0, n_sub, body, (m_acc[...], lw_acc[...]),
                                  unroll=True)
    m_acc[...] = m_fin
    lw_acc[...] = lw_fin

    @pl.when(n_idx == pl.num_programs(2) - 1)
    def _emit():
        stats_ref[...] = jnp.concatenate([m_fin, lw_fin], axis=1)


# ----------------------------------------------------------------------------
# Wrapper
# ----------------------------------------------------------------------------
def gmm_score_empirical_bayes(x, t, train_data, marginal_prob_mean,
                              marginal_prob_std, tau_constant=1.0,
                              prepared=None):
    """Pallas-backed forward pass of GMM_score_EmpiricalBayes."""
    B, D = x.shape
    N, D2 = train_data.shape
    assert D2 == D

    x = x.astype(jnp.float32)
    meanf = marginal_prob_mean(t).astype(jnp.float32).reshape(B, 1)
    sigma = marginal_prob_std(t).astype(jnp.float32).reshape(B, 1)

    if prepared is None:
        prepared = prepare_train_data(train_data)
    plan, aug = prepared
    assert aug.shape == (D + 3, plan.n_pad)

    # batch tiling: bias tile_b up so large B does not re-stream the training set
    tile_b = min(_round_up(B, 8), 128)
    b_pad = _round_up(B, tile_b)
    b_tiles = b_pad // tile_b

    # single packed batch-side stream [x | mean | sigma]; padded rows use sigma=1
    xms = jnp.concatenate([x, meanf, sigma], axis=1)
    if b_pad != B:
        pad_rows = jnp.concatenate(
            [jnp.zeros((b_pad - B, D), jnp.float32),
             jnp.ones((b_pad - B, 2), jnp.float32)], axis=1)
        xms = jnp.concatenate([xms, pad_rows], axis=0)

    kernel = functools.partial(
        _gmm_eb_stats_kernel, feat_dim=D, sub_n=plan.sub_n,
        n_sub=plan.tile_n // plan.sub_n, use_mxu_logpdf=(D >= 64))

    # VMEM: double-buffered (D+3, tile_n) stream + ~6 live (tile_b, sub_n) blocks,
    # clamped at 40 MiB so a big-N config still fits v7x's 64 MiB/TC.
    est = (2 * (D + 3) * plan.tile_n * 4
           + 4 * tile_b * (D + 2) * 4
           + tile_b * (D + 2) * 4
           + 6 * tile_b * plan.sub_n * 4)
    vmem_limit = int(min(max(2 * est, 4 * 2 ** 20), 40 * 2 ** 20))

    n_tiles, n_splits = plan.n_tiles, plan.n_splits
    stats = pl.pallas_call(
        kernel,
        out_shape=jax.ShapeDtypeStruct((n_splits * b_pad, D + 2), jnp.float32),
        grid_spec=pltpu.PrefetchScalarGridSpec(
            num_scalar_prefetch=0,
            grid=(n_splits, b_tiles, n_tiles),
            in_specs=[
                pl.BlockSpec((tile_b, D + 2), lambda s, b, n: (b, 0)),       # [x|m|s]
                pl.BlockSpec((D + 3, plan.tile_n),
                             lambda s, b, n: (0, s * n_tiles + n)),          # aug
            ],
            out_specs=pl.BlockSpec((tile_b, D + 2),
                                   lambda s, b, n: (s * b_tiles + b, 0)),    # stats
            scratch_shapes=[
                pltpu.VMEM((tile_b, 1), jnp.float32),        # running max
                pltpu.VMEM((tile_b, D + 1), jnp.float32),    # running [sum p*y, sum p]
            ]),
        compiler_params=pltpu.CompilerParams(
            dimension_semantics=("parallel", "parallel", "arbitrary"),
            vmem_limit_bytes=vmem_limit),
    )(xms, aug)

    # tiny O(B*D) epilogue: merge per-split stats, EB-renormalize, form the score
    st = stats.reshape(n_splits, b_pad, D + 2)[:, :B, :]
    m_p, wy_p, l_p = st[..., 0], st[..., 1:1 + D], st[..., 1 + D]
    m = jnp.max(m_p, axis=0)                         # (B,)
    r = jnp.exp(m_p - m[None, :])                    # (S, B)
    l_tot = jnp.sum(r * l_p, axis=0)                 # (B,)
    wy_tot = jnp.sum(r[..., None] * wy_p, axis=0)    # (B, D)
    lse = m + jnp.log(l_tot)
    log_tau = jnp.log(jnp.asarray(tau_constant, jnp.float32))
    scale = jnp.exp(m - jnp.maximum(lse, log_tau))   # (B,)
    evals = meanf * (scale[:, None] * wy_tot) - (scale * l_tot)[:, None] * x
    evals = jnp.where(jnp.isnan(evals), 0.0, evals)
    return evals / (sigma * sigma)                   # exact 1/sigma^2


# ----------------------------------------------------------------------------
# Pure-JAX reference (mirrors the PyTorch module) for verification.
# ----------------------------------------------------------------------------
def _reference(x, t, train_data, marginal_prob_mean, marginal_prob_std,
               tau_constant=1.0):
    sigma = marginal_prob_std(t)
    meanf = marginal_prob_mean(t)
    diff = x[:, None, :] - meanf[:, None, None] * train_data[None, :, :]
    logpdf = -0.5 * jnp.sum(diff ** 2, axis=2) / (sigma ** 2)[:, None]
    log_den = jax.scipy.special.logsumexp(logpdf, axis=1)
    reg_den = jnp.maximum(log_den, jnp.log(tau_constant))
    w = jnp.exp(logpdf - reg_den[:, None])
    evals = meanf[:, None] * jnp.dot(w, train_data,
                                     precision=jax.lax.Precision.HIGHEST)
    evals = evals - jnp.sum(w, axis=1)[:, None] * x
    evals = jnp.where(jnp.isnan(evals), 0.0, evals)
    return evals / (sigma ** 2)[:, None]


if __name__ == "__main__":
    # deterministic, VP-SDE-like marginal probability functions
    def marginal_prob_mean(t):
        return jnp.exp(-0.5 * t)

    def marginal_prob_std(t):
        return jnp.sqrt(1.0 - jnp.exp(-t))

    key = jax.random.PRNGKey(0)
    k1, k2, k3 = jax.random.split(key, 3)

    # 2-D points, ragged N -> exercises mask row, 2-way split, unrolled inner loop
    B, N, D = 8, 1000, 2
    x = jax.random.normal(k1, (B, D), dtype=jnp.float32)
    t = jax.random.uniform(k2, (B,), minval=0.1, maxval=1.0, dtype=jnp.float32)
    train_data = jax.random.normal(k3, (N, D), dtype=jnp.float32) * 2.0

    score = jax.jit(functools.partial(
        gmm_score_empirical_bayes,
        marginal_prob_mean=marginal_prob_mean,
        marginal_prob_std=marginal_prob_std,
        tau_constant=1.0))
    out = jax.block_until_ready(score(x, t, train_data))

    ref = _reference(x, t, train_data, marginal_prob_mean, marginal_prob_std,
                     tau_constant=1.0)
    assert out.shape == (B, D) and out.dtype == jnp.float32
    # tolerance covers the MXU's reduced-precision f32 passes on the in-kernel
    # weighted-sum reduction (the 1/sigma^2 scaling itself is now exact)
    assert jnp.allclose(out, ref, rtol=5e-3, atol=5e-3), (out, ref)

    print("KERNEL_OK")
</pallas_src>

<mosaic_0001>
module attributes {stable_mosaic.version = 11 : i64} {
  func.func @_gmm_eb_stats_kernel(%arg0: i32, %arg1: i32, %arg2: i32, %arg3: memref<8x4xf32, #tpu.memory_space<vmem>>, %arg4: memref<5x512xf32, #tpu.memory_space<vmem>>, %arg5: memref<8x4xf32, #tpu.memory_space<vmem>>, %arg6: memref<8x1xf32, #tpu.memory_space<vmem>>, %arg7: memref<8x3xf32, #tpu.memory_space<vmem>>) attributes {dimension_semantics = [#tpu.dimension_semantics<parallel>, #tpu.dimension_semantics<parallel>, #tpu.dimension_semantics<arbitrary>], iteration_bounds = array<i64: 2, 1, 1>, scalar_prefetch = 0 : i64, scratch_operands = 2 : i64, tpu.core_type = #tpu.core_type<tc>, window_params = [{transform_indices = @transform_0, window_bounds = array<i64: 8, 4>}, {transform_indices = @transform_1, window_bounds = array<i64: 5, 512>}, {transform_indices = @transform_2, window_bounds = array<i64: 8, 4>}]} {
    %c0_i32 = arith.constant 0 : i32
    %0 = arith.cmpi eq, %arg2, %c0_i32 : i32
    %1 = arith.extui %0 : i1 to i32
    %c0_i32_0 = arith.constant 0 : i32
    %2 = arith.cmpi ne, %1, %c0_i32_0 : i32
    scf.if %2 {
      %cst_19 = arith.constant 0xFF800000 : f32
      %69 = vector.broadcast %cst_19 : f32 to vector<8x1xf32>
      %c0_20 = arith.constant 0 : index
      %c0_21 = arith.constant 0 : index
      %70 = vector.load %arg6[%c0_20, %c0_21] : memref<8x1xf32, #tpu.memory_space<vmem>>, vector<8x1xf32>
      tpu.vector_store %arg6[%c0_20, %c0_21], %69 {strides = array<i32>} : memref<8x1xf32, #tpu.memory_space<vmem>>, vector<8x1xf32>,
      %cst_22 = arith.constant 0.000000e+00 : f32
      %71 = vector.broadcast %cst_22 : f32 to vector<8x3xf32>
      %c0_23 = arith.constant 0 : index
      %c0_24 = arith.constant 0 : index
      %72 = vector.load %arg7[%c0_23, %c0_24] : memref<8x3xf32, #tpu.memory_space<vmem>>, vector<8x3xf32>
      tpu.vector_store %arg7[%c0_23, %c0_24], %71 {strides = array<i32>} : memref<8x3xf32, #tpu.memory_space<vmem>>, vector<8x3xf32>,
    } else {
    }
    %c0 = arith.constant 0 : index
    %c0_1 = arith.constant 0 : index
    %3 = vector.load %arg3[%c0, %c0_1] : memref<8x4xf32, #tpu.memory_space<vmem>>, vector<8x4xf32>
    %4 = vector.extract_strided_slice %3 {offsets = [0, 0], sizes = [8, 2], strides = [1, 1]} : vector<8x4xf32> to vector<8x2xf32>
    %5 = vector.extract_strided_slice %3 {offsets = [0, 2], sizes = [8, 1], strides = [1, 1]} : vector<8x4xf32> to vector<8x1xf32>
    %6 = vector.extract_strided_slice %3 {offsets = [0, 3], sizes = [8, 1], strides = [1, 1]} : vector<8x4xf32> to vector<8x1xf32>
    %7 = arith.mulf %6, %6 : vector<8x1xf32>
    %cst = arith.constant 1.000000e+00 : f32
    %8 = vector.broadcast %cst : f32 to vector<8x1xf32>
    %9 = arith.divf %8, %7 : vector<8x1xf32>
    %10 = arith.mulf %4, %4 : vector<8x2xf32>
    %cst_2 = arith.constant dense<0.000000e+00> : vector<8xf32>
    %11 = vector.multi_reduction <add>, %10, %cst_2 [1] : vector<8x2xf32> to vector<8xf32>
    %12 = vector.shape_cast %11 : vector<8xf32> to vector<8x1xf32>
    %cst_3 = arith.constant -5.000000e-01 : f32
    %13 = vector.broadcast %cst_3 : f32 to vector<8x1xf32>
    %14 = arith.mulf %13, %9 : vector<8x1xf32>
    %15 = arith.mulf %14, %12 : vector<8x1xf32>
    %16 = arith.mulf %5, %9 : vector<8x1xf32>
    %17 = arith.mulf %5, %5 : vector<8x1xf32>
    %cst_4 = arith.constant -5.000000e-01 : f32
    %18 = vector.broadcast %cst_4 : f32 to vector<8x1xf32>
    %19 = arith.mulf %18, %17 : vector<8x1xf32>
    %20 = arith.mulf %19, %9 : vector<8x1xf32>
    %21 = vector.broadcast %16 : vector<8x1xf32> to vector<8x2xf32>
    %22 = arith.mulf %21, %4 : vector<8x2xf32>
    %c0_5 = arith.constant 0 : index
    %c0_6 = arith.constant 0 : index
    %23 = vector.load %arg6[%c0_5, %c0_6] : memref<8x1xf32, #tpu.memory_space<vmem>>, vector<8x1xf32>
    %c0_7 = arith.constant 0 : index
    %c0_8 = arith.constant 0 : index
    %24 = vector.load %arg7[%c0_7, %c0_8] : memref<8x3xf32, #tpu.memory_space<vmem>>, vector<8x3xf32>
    %c0_i32_9 = arith.constant 0 : i32
    %c512_i32 = arith.constant 512 : i32
    %25 = arith.muli %c0_i32_9, %c512_i32 : i32
    %26 = tpu.assume_multiple %25, 512 : i32
    %c0_10 = arith.constant 0 : index
    %27 = arith.index_cast %26 : i32 to index
    %28 = vector.load %arg4[%c0_10, %27] : memref<5x512xf32, #tpu.memory_space<vmem>>, vector<3x512xf32>
    %c4 = arith.constant 4 : index
    %29 = arith.index_cast %26 : i32 to index
    %30 = vector.load %arg4[%c4, %29] : memref<5x512xf32, #tpu.memory_space<vmem>>, vector<1x512xf32>
    %c3 = arith.constant 3 : index
    %31 = arith.index_cast %26 : i32 to index
    %32 = vector.load %arg4[%c3, %31] : memref<5x512xf32, #tpu.memory_space<vmem>>, vector<1x512xf32>
    %33 = vector.broadcast %20 : vector<8x1xf32> to vector<8x512xf32>
    %34 = vector.broadcast %32 : vector<1x512xf32> to vector<8x512xf32>
    %35 = arith.mulf %33, %34 : vector<8x512xf32>
    %36 = vector.broadcast %15 : vector<8x1xf32> to vector<8x512xf32>
    %37 = arith.addf %36, %35 : vector<8x512xf32>
    %38 = vector.broadcast %30 : vector<1x512xf32> to vector<8x512xf32>
    %39 = arith.addf %37, %38 : vector<8x512xf32>
    %40 = vector.extract_strided_slice %22 {offsets = [0, 0], sizes = [8, 1], strides = [1, 1]} : vector<8x2xf32> to vector<8x1xf32>
    %41 = vector.extract_strided_slice %28 {offsets = [0, 0], sizes = [1, 512], strides = [1, 1]} : vector<3x512xf32> to vector<1x512xf32>
    %42 = vector.broadcast %40 : vector<8x1xf32> to vector<8x512xf32>
    %43 = vector.broadcast %41 : vector<1x512xf32> to vector<8x512xf32>
    %44 = arith.mulf %42, %43 : vector<8x512xf32>
    %45 = arith.addf %39, %44 : vector<8x512xf32>
    %46 = vector.extract_strided_slice %22 {offsets = [0, 1], sizes = [8, 1], strides = [1, 1]} : vector<8x2xf32> to vector<8x1xf32>
    %47 = vector.extract_strided_slice %28 {offsets = [1, 0], sizes = [1, 512], strides = [1, 1]} : vector<3x512xf32> to vector<1x512xf32>
    %48 = vector.broadcast %46 : vector<8x1xf32> to vector<8x512xf32>
    %49 = vector.broadcast %47 : vector<1x512xf32> to vector<8x512xf32>
    %50 = arith.mulf %48, %49 : vector<8x512xf32>
    %51 = arith.addf %45, %50 : vector<8x512xf32>
    %cst_11 = arith.constant dense<0xFF800000> : vector<8xf32>
    %52 = vector.multi_reduction <maximumf>, %51, %cst_11 [1] : vector<8x512xf32> to vector<8xf32>
    %53 = vector.shape_cast %52 : vector<8xf32> to vector<8x1xf32>
    %54 = arith.maximumf %23, %53 : vector<8x1xf32>
    %55 = arith.subf %23, %54 : vector<8x1xf32>
    %56 = math.exp %55 : vector<8x1xf32>
    %57 = vector.broadcast %54 : vector<8x1xf32> to vector<8x512xf32>
    %58 = arith.subf %51, %57 : vector<8x512xf32>
    %59 = math.exp %58 : vector<8x512xf32>
    %cst_12 = arith.constant dense<0.000000e+00> : vector<8x3xf32>
    %60 = tpu.matmul %59, %28, %cst_12 {dimension_numbers = #tpu.dot_dimension_numbers<[1], [1], [0], [0], [0, 0, 1, 0], [], []>} : vector<8x512xf32>, vector<3x512xf32>, vector<8x3xf32> -> vector<8x3xf32>
    %61 = vector.broadcast %56 : vector<8x1xf32> to vector<8x3xf32>
    %62 = arith.mulf %61, %24 : vector<8x3xf32>
    %63 = arith.addf %62, %60 : vector<8x3xf32>
    %c1_i32 = arith.constant 1 : i32
    %c0_13 = arith.constant 0 : index
    %c0_14 = arith.constant 0 : index
    %64 = vector.load %arg6[%c0_13, %c0_14] : memref<8x1xf32, #tpu.memory_space<vmem>>, vector<8x1xf32>
    tpu.vector_store %arg6[%c0_13, %c0_14], %54 {strides = array<i32>} : memref<8x1xf32, #tpu.memory_space<vmem>>, vector<8x1xf32>,
    %c0_15 = arith.constant 0 : index
    %c0_16 = arith.constant 0 : index
    %65 = vector.load %arg7[%c0_15, %c0_16] : memref<8x3xf32, #tpu.memory_space<vmem>>, vector<8x3xf32>
    tpu.vector_store %arg7[%c0_15, %c0_16], %63 {strides = array<i32>} : memref<8x3xf32, #tpu.memory_space<vmem>>, vector<8x3xf32>,
    %c0_i32_17 = arith.constant 0 : i32
    %66 = arith.cmpi eq, %arg2, %c0_i32_17 : i32
    %67 = arith.extui %66 : i1 to i32
    %c0_i32_18 = arith.constant 0 : i32
    %68 = arith.cmpi ne, %67, %c0_i32_18 : i32
    scf.if %68 {
      %69 = tpu.concatenate %54, %63 in 1 : vector<8x1xf32>, vector<8x3xf32> -> vector<8x4xf32>
      %c0_19 = arith.constant 0 : index
      %c0_20 = arith.constant 0 : index
      %70 = vector.load %arg5[%c0_19, %c0_20] : memref<8x4xf32, #tpu.memory_space<vmem>>, vector<8x4xf32>
      tpu.vector_store %arg5[%c0_19, %c0_20], %69 {strides = array<i32>} : memref<8x4xf32, #tpu.memory_space<vmem>>, vector<8x4xf32>,
    } else {
    }
    return
  }
  func.func @transform_0(%arg0: i32, %arg1: i32, %arg2: i32) -> (i32, i32) {
    %c0_i32 = arith.constant 0 : i32
    %c0_i32_0 = arith.constant 0 : i32
    return %arg1, %c0_i32 : i32, i32
  }
  func.func @transform_1(%arg0: i32, %arg1: i32, %arg2: i32) -> (i32, i32) {
    %c1_i32 = arith.constant 1 : i32
    %0 = arith.muli %arg0, %c1_i32 : i32
    %1 = arith.addi %0, %arg2 : i32
    %c0_i32 = arith.constant 0 : i32
    %c0_i32_0 = arith.constant 0 : i32
    return %c0_i32, %1 : i32, i32
  }
  func.func @transform_2(%arg0: i32, %arg1: i32, %arg2: i32) -> (i32, i32) {
    %c1_i32 = arith.constant 1 : i32
    %0 = arith.muli %arg0, %c1_i32 : i32
    %1 = arith.addi %0, %arg1 : i32
    %c0_i32 = arith.constant 0 : i32
    %c0_i32_0 = arith.constant 0 : i32
    return %1, %c0_i32 : i32, i32
  }
}

</mosaic_0001>

<bundles_post_ra>
// kernel: gmm_score_empirical_bayes.1
= control target key start
LH: loop header
LB: loop body
LE: loop exit
PB: predicated region body
PF: predicated region fallthrough
CT: control target
= control target key end

     0   :  { %s734_s9 = smov 0   ;;  %s736_s10 = smov 0   ;;  %s808_s0 = inlined_call_operand.vmem [shape: f32[8,4], index: 0, kind: input, shape index: {}]   ;;  %s809_s1 = inlined_call_operand.vmem [shape: f32[5,1024], index: 1, kind: input, shape index: {}]   ;;  %s810_s2 = inlined_call_operand.vmem [shape: f32[16,4], index: 2, kind: output, shape index: {}]  }
   0x1   :  { %s738_s11 = smov 0  }
   0x2 LB: > { %s31_s12 = sadd.s32 1, %s705_s10  ;;  %p629_p0 = scmp.ge.s32.totalorder %s709_s11, 1  ;;  %s709_s11 = sphi %s738_s11, %s12_s11   ;;  %s705_s10 = sphi %s736_s10, %s812_s10   ;;  %s701_s9 = sphi %s734_s9, %s811_s9  }
   0x3   : > { %p33_p1 = scmp.ge.s32.totalorder %s31_s12, 2  ;;  %p147_p2 = scmp.lt.s32.totalorder %s709_s11, 3 }
   0x5   : > { %s814_s12 = smov (%p33_p1, %s31_s12), 0  ;;  %p148_p3 = pnand %p629_p0, %p147_p2 }
   0x6   : > { %s712_s15 = smov (!%p148_p3), 127   ;;  %s630_s16 = sshll.u32 (!%p148_p3), %s701_s9, 2 }
   0x7   : > { %151 = sbr.rel (%p148_p3) target bundleno = 1009 (0x3f1), region = 28  ;;  %p180_p4 = scmp.lt.s32.totalorder (!%p148_p3), %s630_s16, 7 }
   0x8   : > { %s718_s21 = smov (!%p148_p3), 1   ;;  %p187_p5 = scmp.lt.s32.totalorder (!%p148_p3), %s701_s9, 1 }
   0xc   : > { %v200_v0 = vld [vmem:[%s808_s0] sm:$0xff]  ;;  %v711_v2 = vmov 2   ;;  %vm204_vm0 = vcmask 15360   ;;  %v713_v6 = vmov 0   ;;  %v714_v10 = vmov 3   ;;  %s816_s16 = smov (!%p180_p4, %s630_s16), 7 }
   0xd   : > { %v201_v1 = vmul.f32 %v200_v0, %v200_v0  ;;  %669 = vset.pattern.permute.xlu1 %v711_v2  ;;  %673 = vset.pattern.permute.xlu0 %v713_v6  ;;  %s631_s17 = sshll.u32 %s816_s16, 3  ;;  %v715_v20 = vmov 1   ;;  %vm196_vm1 = vcmask 7168   ;;  %v716_v21 = vmov -inf   ;;  %s818_s9 = smov (!%p187_p5, %s701_s9), 1 }
   0xe   : > { %s761_s20 = scalar_lea.vmem %s809_s1, %s631_s17  ;;  %197 = vst.msk [vmem:[#allocation2] sm:$0xff] %vm196_vm1, %v716_v21  ;;  %v239_v22 = vlaneseq  ;;  %vm198_vm2 = vcmask 23552   ;;  %s632_s22 = sshll.u32 %s818_s9, 3  ;;  %vm539_vm3 = vcmask 31744  }
   0xf   : > { %675 = vrcp.f32 %v201_v1  ;;  %v205_v4 = vsel %vm204_vm0, %v201_v1, 0.0  ;;  %v215_v7 = vmul.f32 -0.5, %v201_v1  ;;  %v764_v14 = vld [vmem:[%s761_s20 + $0x8] sm:$0x7]  ;;  %v767_v15 = vld [vmem:[%s761_s20] sm:$0x7]  ;;  %s190_s25 = scalar_lea.vmem %s810_s2, %s632_s22 }
  0x10   : > { %v770_v16 = vld [vmem:[%s761_s20 + $0x18] sm:$0x7]  ;;  %410 = vmatprep.subr.mxu0 %v764_v14  ;;  %v774_v17 = vld [vmem:[%s761_s20 + $0x10] sm:$0x7]  ;;  %v240_v23 = vshrl.u32 %v239_v22, 7  ;;  %v717_v22 = vmov 0.0  }
  0x11   : > { %480 = vmatprep.subr.mxu1 %v770_v16  ;;  %411 = vmatpush1.xpose.msra.mxu0 %v767_v15  ;;  %v634_v28 = vld [vmem:[%s761_s20 + $0x3] ss:$8 sm:$0xf]  ;;  %v633_v34 = vld [vmem:[%s761_s20 + $0x4] ss:$8 sm:$0xf] }
  0x12   : > { %481 = vmatpush1.xpose.msra.mxu1 %v774_v17  ;;  %v241_v24 = vsub.s32 0, %v240_v23  ;;  %v245_v25 = vsub.s32 1, %v240_v23  ;;  %v249_v26 = vsub.s32 2, %v240_v23  ;;  %v253_v27 = vsub.s32 3, %v240_v23  ;;  %199 = vst.msk [vmem:[#allocation3] sm:$0xff] %vm198_vm2, %v717_v22 }
  0x14   : > { %v242_v30 = vrot.slane %v634_v28, %v241_v24  ;;  %v246_v31 = vrot.slane %v634_v28, %v245_v25  ;;  %v250_v32 = vrot.slane %v634_v28, %v249_v26  ;;  %v254_v33 = vrot.slane %v634_v28, %v253_v27 }
  0x15   : > { %v305_v36 = vrot.slane %v767_v15, %v241_v24  ;;  %v309_v37 = vrot.slane %v764_v14, %v241_v24  ;;  %v313_v38 = vrot.slane %v774_v17, %v241_v24  ;;  %v317_v39 = vrot.slane %v770_v16, %v241_v24 }
  0x16   : > { %v276_v44 = vrot.slane %v633_v34, %v241_v24  ;;  %v280_v45 = vrot.slane %v633_v34, %v245_v25  ;;  %v284_v46 = vrot.slane %v633_v34, %v249_v26  ;;  %v288_v47 = vrot.slane %v633_v34, %v253_v27 }
  0x17   : > { %v333_v57 = vrot.slane %v767_v15, %v245_v25  ;;  %v337_v58 = vrot.slane %v764_v14, %v245_v25  ;;  %v341_v59 = vrot.slane %v774_v17, %v245_v25  ;;  %v345_v60 = vrot.slane %v770_v16, %v245_v25  ;;  %v223_v17 = vld [vmem:[#allocation2] sm:$0xff] }
  0x1c   : > { %v676_v3 = vpop.eup %675 }
  0x1d   : > { %211 = vrot.lane.b32.xlu0 %v676_v3, %s712_s15  ;;  %v208_v11 = vmul.f32 -0.5, %v676_v3 }
  0x3c   : > { %206 = vadd.xlane.f32.xlu0 %v205_v4 }
  0x8f   : > { %v212_v5 = vpop.permute.xlu0 %211 }
  0x90   : > { %v214_v8 = vmul.f32 %v212_v5, %v200_v0  ;;  %v216_v9 = vmul.f32 %v215_v7, %v212_v5 }
  0x92   : > { %219 = vperm.xlu1 %669, %v214_v8  }
  0x96   : > { %235 = vperm.xlu1 %669, %v216_v9  }
  0x9a   : > { %670 = vset.pattern.permute.xlu1 %v714_v10 }
  0xc5   : > { %v207_v12 = vpop.xlane.xlu0 %206 }
  0xc6   : > { %v209_v13 = vmul.f32 %v208_v11, %v207_v12 }
  0xc8   : > { %265 = vperm.xlu1 %670, %v209_v13  }
  0xcc   : > { %671 = vset.pattern.permute.xlu1 %v713_v6 }
 0x10d   : > { %v220_v18 = vpop.permute.xlu1 %219 }
 0x10e   : > { %v222_v19 = vmul.f32 %v220_v18, %v200_v0 }
 0x110   : > { %299 = vperm.xlu1 %671, %v222_v19  }
 0x111   : > { %v236_v29 = vpop.permute.xlu1 %235 }
 0x112   : > { %v259_v40 = vmul.f32 %v242_v30, %v236_v29  ;;  %v260_v41 = vmul.f32 %v246_v31, %v236_v29  ;;  %v261_v42 = vmul.f32 %v250_v32, %v236_v29  ;;  %v262_v43 = vmul.f32 %v254_v33, %v236_v29 }
 0x114   : > { %672 = vset.pattern.permute.xlu1 %v715_v20 }
 0x115   : > { %327 = vperm.xlu1 %672, %v222_v19  }
 0x119   : > { %674 = vset.pattern.permute.xlu1 %v713_v6 }
 0x143   : > { %v266_v35 = vpop.permute.xlu1 %265 }
 0x144   : > { %v268_v48 = vadd.f32 %v266_v35, %v259_v40  ;;  %v269_v49 = vadd.f32 %v266_v35, %v260_v41  ;;  %v270_v50 = vadd.f32 %v266_v35, %v261_v42  ;;  %v271_v51 = vadd.f32 %v266_v35, %v262_v43 }
 0x146   : > { %v293_v61 = vadd.f32 %v276_v44, %v268_v48  ;;  %v294_v62 = vadd.f32 %v280_v45, %v269_v49  ;;  %v295_v63 = vadd.f32 %v284_v46, %v270_v50  ;;  %v296_v0 = vadd.f32 %v288_v47, %v271_v51 }
 0x18b   : > { %v300_v52 = vpop.permute.xlu1 %299 }
 0x18c   : > { %v318_v53 = vmul.f32 %v305_v36, %v300_v52  ;;  %v319_v54 = vmul.f32 %v309_v37, %v300_v52  ;;  %v320_v55 = vmul.f32 %v313_v38, %v300_v52  ;;  %v321_v56 = vmul.f32 %v317_v39, %v300_v52  ;;  %v224_v37 = vld [vmem:[#allocation3] sm:$0xff] }
 0x18e   : > { %v322_v2 = vadd.f32 %v318_v53, %v293_v61  ;;  %v323_v3 = vadd.f32 %v319_v54, %v294_v62  ;;  %v324_v4 = vadd.f32 %v320_v55, %v295_v63  ;;  %v325_v5 = vadd.f32 %v321_v56, %v296_v0 }
 0x190   : > { %v328_v1 = vpop.permute.xlu1 %327 }
 0x191   : > { %v346_v6 = vmul.f32 %v333_v57, %v328_v1  ;;  %v347_v7 = vmul.f32 %v337_v58, %v328_v1  ;;  %v348_v8 = vmul.f32 %v341_v59, %v328_v1  ;;  %v349_v9 = vmul.f32 %v345_v60, %v328_v1 }
 0x193   : > { %v350_v10 = vadd.f32 %v346_v6, %v322_v2  ;;  %v351_v11 = vadd.f32 %v347_v7, %v323_v3  ;;  %v352_v12 = vadd.f32 %v348_v8, %v324_v4  ;;  %v353_v13 = vadd.f32 %v349_v9, %v325_v5 }
 0x195   : > { %v354_v14 = vmax.f32 %v350_v10, %v351_v11  ;;  %v355_v15 = vmax.f32 %v352_v12, %v353_v13 }
 0x197   : > { %v356_v16 = vmax.f32 %v354_v14, %v355_v15 }
 0x199   : > { %357 = vmax.xlane.f32.xlu1 %v356_v16 }
 0x222   : > { %v358_v18 = vpop.xlane.xlu1 %357 }
 0x223   : > { %v359_v19 = vmax.f32 %v223_v17, %v358_v18 }
 0x225   : > { %v360_v20 = vsub.f32 %v223_v17, %v359_v19  ;;  %528 = vst.msk [vmem:[#allocation2] sm:$0xff] %vm196_vm1, %v359_v19  ;;  %365 = vperm.xlu0 %673, %v359_v19  }
 0x227   : > { %v361_v21 = vmul.f32 1.442695, %v360_v20 }
 0x229   : > { %677 = vpow2.f32 %v361_v21 }
 0x236   : > { %v678_v23 = vpop.eup %677 }
 0x237   : > { %522 = vperm.xlu1 %674, %v678_v23  }
 0x2a0   : > { %v366_v24 = vpop.permute.xlu0 %365 }
 0x2a1   : > { %v368_v25 = vsub.f32 %v350_v10, %v366_v24  ;;  %v369_v26 = vsub.f32 %v351_v11, %v366_v24  ;;  %v370_v27 = vsub.f32 %v352_v12, %v366_v24  ;;  %v371_v28 = vsub.f32 %v353_v13, %v366_v24 }
 0x2a3   : > { %v372_v29 = vmul.f32 1.442695, %v368_v25  ;;  %v376_v30 = vmul.f32 1.442695, %v370_v27  ;;  %v374_v31 = vmul.f32 1.442695, %v369_v26 }
 0x2a4   : > { %v378_v32 = vmul.f32 1.442695, %v371_v28 }
 0x2a5   : > { %679 = vpow2.f32 %v372_v29 }
 0x2a6   : > { %681 = vpow2.f32 %v376_v30 }
 0x2a7   : > { %683 = vpow2.f32 %v374_v31 }
 0x2a8   : > { %685 = vpow2.f32 %v378_v32 }
 0x2b2   : > { %v680_v33 = vpop.eup %679  ;;  %v523_v38 = vpop.permute.xlu1 %522 }
 0x2b3   : > { %v682_v34 = vpop.eup %681  ;;  %v525_v41 = vmul.f32 %v523_v38, %v224_v37 }
 0x2b4   : > { %v684_v35 = vpop.eup %683 }
 0x2b5   : > { %v686_v36 = vpop.eup %685  ;;  %444 = vmatprep.mubr.f32.mxu0 %v684_v35 }
 0x2b6   : > { %514 = vmatprep.mubr.f32.mxu1 %v686_v36  ;;  %445 = vmatmul.mubr.f32.vlgmr.msra.gmra.mxu0 %v680_v33 }
 0x2b7   : > { %515 = vmatmul.mubr.f32.vlgmr.msra.gmra.mxu1 %v682_v34 }
 0x376   : > { %v446_v39 = vpop.f32.mrf.mxu0 }
 0x377   : > { %v516_v40 = vpop.f32.mrf.mxu1 }
 0x378   : > { %v517_v42 = vadd.f32 %v516_v40, %v446_v39  ;;  %v448_v43 = vpop.f32.mrf.mxu0 }
 0x379   : > { %v518_v44 = vpop.f32.mrf.mxu1 }
 0x37a   : > { %v526_v45 = vadd.f32 %v525_v41, %v517_v42 }
 0x37c   : > { %530 = vst.msk [vmem:[#allocation3] sm:$0xff] %vm198_vm2, %v526_v45  ;;  %535 = vrot.lane.b32.xlu1 %v526_v45, %s718_s21 }
 0x3ee   : > { %v536_v46 = vpop.permute.xlu1 %535 }
 0x3ef   : > { %v538_v47 = vsel %vm196_vm1, %v359_v19, %v536_v46 }
 0x3f0   : > { %540 = vst.msk [vmem:[%s190_s25] sm:$0xff] %vm539_vm3, %v538_v47 }
 0x3f1 PF: > { %s12_s11 = sadd.s32 1, %s709_s11   ;;  %s811_s9 = smov %s705_s10 }
 0x3f2   : > { %p9_p6 = scmp.ge.s32.totalorder %s12_s11, 4   ;;  %s812_s10 = smov %s814_s12 }
 0x3f4   :  { %11 = sbr.rel (!%p9_p6) target bundleno = 2 (0x2), region = 71 }

</bundles_post_ra>
